<compile_context>
chip_gen: v5e
topology: v5e:2x2
jax: 0.10.0
libtpu: 0.0.40
codegen_flags: <defaults>
</compile_context>

<pallas_src>
import functools

import jax
import jax.numpy as jnp
from jax.experimental import pallas as pl
from jax.experimental.pallas import tpu as pltpu

INPUT_SIZE = 1
HIDDEN_SIZE = 128
OUTPUT_SIZE = 10
TAU = 2.0
V_TH = 1.0


def _snn_kernel(x_ref, w1_ref, b1_ref, w2_ref, b2_ref, out_ref, s1_ref,
                *, seq_len, bp, start_idx):
    """x_ref: (S*Bp, 1)  w1_ref: (1, H)  b1_ref: (1, H)
       w2_ref: (H, Op)   b2_ref: (1, Op) out_ref: (Bp, Op)
       s1_ref: (S*Bp, H) VMEM scratch (holds H1, then overwritten with S1)."""
    inv_tau = 1.0 / TAU
    hidden = s1_ref.shape[1]
    op = out_ref.shape[1]

    # fc1 for every time step at once. INPUT_SIZE == 1, so this is an outer
    # product done on the VPU (lane-broadcast x, sublane-broadcast w1) — no MXU.
    s1_ref[...] = x_ref[...] * w1_ref[...] + b1_ref[...]

    # LIF1: sequential elementwise scan over time (unrolled). Spikes overwrite
    # the charge slab in place, so the same scratch feeds the batched fc2.
    v1 = jnp.zeros((bp, hidden), jnp.float32)
    for t in range(seq_len):
        sl = pl.ds(t * bp, bp)
        h1 = s1_ref[sl, :]
        v1 = v1 + (h1 - v1) * inv_tau          # decay_input charge, v_reset=0
        s1 = (v1 >= V_TH).astype(jnp.float32)  # heaviside spike
        s1_ref[sl, :] = s1
        v1 = jnp.where(s1 > 0.0, 0.0, v1)      # hard reset

    # fc2 hoisted out of the recurrence: one (S*Bp, H) x (H, Op) MXU matmul.
    h2_all = jnp.dot(s1_ref[...], w2_ref[...],
                     preferred_element_type=jnp.float32) + b2_ref[...]

    # LIF2 scan + spike integration over the final third of the sequence,
    # carried entirely in vregs; single lane-dense store at the end.
    v2 = jnp.zeros((bp, op), jnp.float32)
    acc = jnp.zeros((bp, op), jnp.float32)
    for t in range(seq_len):
        h2 = h2_all[t * bp:(t + 1) * bp, :]
        v2 = v2 + (h2 - v2) * inv_tau
        s2 = (v2 >= V_TH).astype(jnp.float32)
        v2 = jnp.where(s2 > 0.0, 0.0, v2)
        if t >= start_idx:
            acc = acc + s2

    out_ref[...] = acc


def snn_forward(x, w1_t, b1, w2_t, b2):
    """x: [batch, seq, 1] float32.  Weights pre-transposed: w1_t [1,H], w2_t [H,O].
    Returns [batch, O] float32."""
    B, S, D = x.shape
    assert D == INPUT_SIZE == 1
    H = w1_t.shape[1]
    O = w2_t.shape[1]
    start_idx = S * 2 // 3

    # pad batch (sublane dim) to a multiple of 8 and output (lane dim) to 128
    Bp = ((B + 7) // 8) * 8
    Op = ((O + 127) // 128) * 128

    # time-major, batch-padded, flattened to a (S*Bp, 1) column
    x_tm = jnp.transpose(x, (1, 0, 2)).astype(jnp.float32)   # (S, B, 1)
    x_tm = jnp.pad(x_tm, ((0, 0), (0, Bp - B), (0, 0)))
    x_flat = x_tm.reshape(S * Bp, 1)

    w1_2d = w1_t.astype(jnp.float32)                          # (1, H)
    b1_2d = b1.reshape(1, H).astype(jnp.float32)
    w2_p = jnp.pad(w2_t.astype(jnp.float32), ((0, 0), (0, Op - O)))   # (H, Op)
    b2_p = jnp.pad(b2.astype(jnp.float32), ((0, Op - O),)).reshape(1, Op)

    kernel = functools.partial(_snn_kernel, seq_len=S, bp=Bp, start_idx=start_idx)
    vmem_spec = lambda: pl.BlockSpec(memory_space=pltpu.MemorySpace.VMEM)

    out = pl.pallas_call(
        kernel,
        out_shape=jax.ShapeDtypeStruct((Bp, Op), jnp.float32),
        in_specs=[vmem_spec() for _ in range(5)],   # whole arrays resident in VMEM
        out_specs=vmem_spec(),
        scratch_shapes=[pltpu.VMEM((S * Bp, H), jnp.float32)],  # H1 / S1 slab
    )(x_flat, w1_2d, b1_2d, w2_p, b2_p)

    return out[:B, :O]


def snn_reference(x, w1_t, b1, w2_t, b2):
    """Pure-JAX reference matching the PyTorch forward (step-by-step loop)."""
    B, S, D = x.shape
    start_idx = S * 2 // 3
    H = w1_t.shape[1]
    O = w2_t.shape[1]
    v1 = jnp.zeros((B, H), jnp.float32)
    v2 = jnp.zeros((B, O), jnp.float32)
    acc = jnp.zeros((B, O), jnp.float32)
    for t in range(S):
        # fc1 with in_features=1 is mathematically an outer product
        h1 = x[:, t, :] * w1_t[0:1, :] + b1
        v1 = v1 + (h1 - v1) / TAU
        s1 = (v1 >= V_TH).astype(jnp.float32)
        v1 = jnp.where(s1 > 0, 0.0, v1)
        h2 = s1 @ w2_t + b2
        v2 = v2 + (h2 - v2) / TAU
        s2 = (v2 >= V_TH).astype(jnp.float32)
        v2 = jnp.where(s2 > 0, 0.0, v2)
        if t >= start_idx:
            acc = acc + s2
    return acc


if __name__ == "__main__":
    key = jax.random.PRNGKey(0)
    B, S, D, H, O = 4, 12, INPUT_SIZE, HIDDEN_SIZE, OUTPUT_SIZE

    k_x, k_w1, k_b1, k_w2, k_b2 = jax.random.split(key, 5)
    # deterministic inputs / Linear-like uniform(-1/sqrt(fan_in), 1/sqrt(fan_in))
    x = jax.random.uniform(k_x, (B, S, D), jnp.float32, 0.0, 2.0)
    lim1 = 1.0 / (D ** 0.5)
    w1_t = jax.random.uniform(k_w1, (D, H), jnp.float32, -lim1, lim1)   # W1^T
    b1 = jax.random.uniform(k_b1, (H,), jnp.float32, -lim1, lim1)
    lim2 = 1.0 / (H ** 0.5)
    w2_t = jax.random.uniform(k_w2, (H, O), jnp.float32, -lim2, lim2)   # W2^T
    b2 = jax.random.uniform(k_b2, (O,), jnp.float32, -lim2, lim2)

    out = jax.block_until_ready(snn_forward(x, w1_t, b1, w2_t, b2))
    ref = snn_reference(x, w1_t, b1, w2_t, b2)
    assert out.shape == (B, O)
    assert jnp.allclose(out, ref, atol=1e-5), (out, ref)
    print("KERNEL_OK")
</pallas_src>

<mosaic_0001>
module attributes {stable_mosaic.version = 11 : i64} {
  func.func @_snn_kernel(%arg0: memref<96x1xf32, #tpu.memory_space<vmem>>, %arg1: memref<1x128xf32, #tpu.memory_space<vmem>>, %arg2: memref<1x128xf32, #tpu.memory_space<vmem>>, %arg3: memref<128x128xf32, #tpu.memory_space<vmem>>, %arg4: memref<1x128xf32, #tpu.memory_space<vmem>>, %arg5: memref<8x128xf32, #tpu.memory_space<vmem>>, %arg6: memref<96x128xf32, #tpu.memory_space<vmem>>) attributes {dimension_semantics = [], scalar_prefetch = 0 : i64, scratch_operands = 1 : i64, tpu.core_type = #tpu.core_type<tc>} {
    %c0 = arith.constant 0 : index
    %c0_0 = arith.constant 0 : index
    %0 = vector.load %arg0[%c0, %c0_0] : memref<96x1xf32, #tpu.memory_space<vmem>>, vector<96x1xf32>
    %c0_1 = arith.constant 0 : index
    %c0_2 = arith.constant 0 : index
    %1 = vector.load %arg1[%c0_1, %c0_2] : memref<1x128xf32, #tpu.memory_space<vmem>>, vector<1x128xf32>
    %2 = vector.broadcast %0 : vector<96x1xf32> to vector<96x128xf32>
    %3 = vector.broadcast %1 : vector<1x128xf32> to vector<96x128xf32>
    %4 = arith.mulf %2, %3 : vector<96x128xf32>
    %c0_3 = arith.constant 0 : index
    %c0_4 = arith.constant 0 : index
    %5 = vector.load %arg2[%c0_3, %c0_4] : memref<1x128xf32, #tpu.memory_space<vmem>>, vector<1x128xf32>
    %6 = vector.broadcast %5 : vector<1x128xf32> to vector<96x128xf32>
    %7 = arith.addf %4, %6 : vector<96x128xf32>
    %c0_5 = arith.constant 0 : index
    %c0_6 = arith.constant 0 : index
    %8 = vector.load %arg6[%c0_5, %c0_6] : memref<96x128xf32, #tpu.memory_space<vmem>>, vector<96x128xf32>
    tpu.vector_store %arg6[%c0_5, %c0_6], %7 {strides = array<i32>} : memref<96x128xf32, #tpu.memory_space<vmem>>, vector<96x128xf32>,
    %cst = arith.constant 0.000000e+00 : f32
    %9 = vector.broadcast %cst : f32 to vector<8x128xf32>
    %c0_7 = arith.constant 0 : index
    %c0_8 = arith.constant 0 : index
    %10 = vector.load %arg6[%c0_7, %c0_8] : memref<96x128xf32, #tpu.memory_space<vmem>>, vector<8x128xf32>
    %11 = arith.subf %10, %9 : vector<8x128xf32>
    %cst_9 = arith.constant 5.000000e-01 : f32
    %12 = vector.broadcast %cst_9 : f32 to vector<8x128xf32>
    %13 = arith.mulf %11, %12 : vector<8x128xf32>
    %14 = arith.addf %9, %13 : vector<8x128xf32>
    %cst_10 = arith.constant 1.000000e+00 : f32
    %15 = vector.broadcast %cst_10 : f32 to vector<8x128xf32>
    %16 = arith.cmpf oge, %14, %15 : vector<8x128xf32>
    %17 = arith.extui %16 : vector<8x128xi1> to vector<8x128xi32>
    %18 = arith.sitofp %17 : vector<8x128xi32> to vector<8x128xf32>
    %c0_11 = arith.constant 0 : index
    %c0_12 = arith.constant 0 : index
    %19 = vector.load %arg6[%c0_11, %c0_12] : memref<96x128xf32, #tpu.memory_space<vmem>>, vector<8x128xf32>
    tpu.vector_store %arg6[%c0_11, %c0_12], %18 {strides = array<i32>} : memref<96x128xf32, #tpu.memory_space<vmem>>, vector<8x128xf32>,
    %cst_13 = arith.constant 0.000000e+00 : f32
    %20 = vector.broadcast %cst_13 : f32 to vector<8x128xf32>
    %21 = arith.cmpf ogt, %18, %20 : vector<8x128xf32>
    %cst_14 = arith.constant 0.000000e+00 : f32
    %22 = vector.broadcast %cst_14 : f32 to vector<8x128xf32>
    %23 = arith.select %21, %22, %14 : vector<8x128xi1>, vector<8x128xf32>
    %c8 = arith.constant 8 : index
    %c0_15 = arith.constant 0 : index
    %24 = vector.load %arg6[%c8, %c0_15] : memref<96x128xf32, #tpu.memory_space<vmem>>, vector<8x128xf32>
    %25 = arith.subf %24, %23 : vector<8x128xf32>
    %cst_16 = arith.constant 5.000000e-01 : f32
    %26 = vector.broadcast %cst_16 : f32 to vector<8x128xf32>
    %27 = arith.mulf %25, %26 : vector<8x128xf32>
    %28 = arith.addf %23, %27 : vector<8x128xf32>
    %cst_17 = arith.constant 1.000000e+00 : f32
    %29 = vector.broadcast %cst_17 : f32 to vector<8x128xf32>
    %30 = arith.cmpf oge, %28, %29 : vector<8x128xf32>
    %31 = arith.extui %30 : vector<8x128xi1> to vector<8x128xi32>
    %32 = arith.sitofp %31 : vector<8x128xi32> to vector<8x128xf32>
    %c8_18 = arith.constant 8 : index
    %c0_19 = arith.constant 0 : index
    %33 = vector.load %arg6[%c8_18, %c0_19] : memref<96x128xf32, #tpu.memory_space<vmem>>, vector<8x128xf32>
    tpu.vector_store %arg6[%c8_18, %c0_19], %32 {strides = array<i32>} : memref<96x128xf32, #tpu.memory_space<vmem>>, vector<8x128xf32>,
    %cst_20 = arith.constant 0.000000e+00 : f32
    %34 = vector.broadcast %cst_20 : f32 to vector<8x128xf32>
    %35 = arith.cmpf ogt, %32, %34 : vector<8x128xf32>
    %cst_21 = arith.constant 0.000000e+00 : f32
    %36 = vector.broadcast %cst_21 : f32 to vector<8x128xf32>
    %37 = arith.select %35, %36, %28 : vector<8x128xi1>, vector<8x128xf32>
    %c16 = arith.constant 16 : index
    %c0_22 = arith.constant 0 : index
    %38 = vector.load %arg6[%c16, %c0_22] : memref<96x128xf32, #tpu.memory_space<vmem>>, vector<8x128xf32>
    %39 = arith.subf %38, %37 : vector<8x128xf32>
    %cst_23 = arith.constant 5.000000e-01 : f32
    %40 = vector.broadcast %cst_23 : f32 to vector<8x128xf32>
    %41 = arith.mulf %39, %40 : vector<8x128xf32>
    %42 = arith.addf %37, %41 : vector<8x128xf32>
    %cst_24 = arith.constant 1.000000e+00 : f32
    %43 = vector.broadcast %cst_24 : f32 to vector<8x128xf32>
    %44 = arith.cmpf oge, %42, %43 : vector<8x128xf32>
    %45 = arith.extui %44 : vector<8x128xi1> to vector<8x128xi32>
    %46 = arith.sitofp %45 : vector<8x128xi32> to vector<8x128xf32>
    %c16_25 = arith.constant 16 : index
    %c0_26 = arith.constant 0 : index
    %47 = vector.load %arg6[%c16_25, %c0_26] : memref<96x128xf32, #tpu.memory_space<vmem>>, vector<8x128xf32>
    tpu.vector_store %arg6[%c16_25, %c0_26], %46 {strides = array<i32>} : memref<96x128xf32, #tpu.memory_space<vmem>>, vector<8x128xf32>,
    %cst_27 = arith.constant 0.000000e+00 : f32
    %48 = vector.broadcast %cst_27 : f32 to vector<8x128xf32>
    %49 = arith.cmpf ogt, %46, %48 : vector<8x128xf32>
    %cst_28 = arith.constant 0.000000e+00 : f32
    %50 = vector.broadcast %cst_28 : f32 to vector<8x128xf32>
    %51 = arith.select %49, %50, %42 : vector<8x128xi1>, vector<8x128xf32>
    %c24 = arith.constant 24 : index
    %c0_29 = arith.constant 0 : index
    %52 = vector.load %arg6[%c24, %c0_29] : memref<96x128xf32, #tpu.memory_space<vmem>>, vector<8x128xf32>
    %53 = arith.subf %52, %51 : vector<8x128xf32>
    %cst_30 = arith.constant 5.000000e-01 : f32
    %54 = vector.broadcast %cst_30 : f32 to vector<8x128xf32>
    %55 = arith.mulf %53, %54 : vector<8x128xf32>
    %56 = arith.addf %51, %55 : vector<8x128xf32>
    %cst_31 = arith.constant 1.000000e+00 : f32
    %57 = vector.broadcast %cst_31 : f32 to vector<8x128xf32>
    %58 = arith.cmpf oge, %56, %57 : vector<8x128xf32>
    %59 = arith.extui %58 : vector<8x128xi1> to vector<8x128xi32>
    %60 = arith.sitofp %59 : vector<8x128xi32> to vector<8x128xf32>
    %c24_32 = arith.constant 24 : index
    %c0_33 = arith.constant 0 : index
    %61 = vector.load %arg6[%c24_32, %c0_33] : memref<96x128xf32, #tpu.memory_space<vmem>>, vector<8x128xf32>
    tpu.vector_store %arg6[%c24_32, %c0_33], %60 {strides = array<i32>} : memref<96x128xf32, #tpu.memory_space<vmem>>, vector<8x128xf32>,
    %cst_34 = arith.constant 0.000000e+00 : f32
    %62 = vector.broadcast %cst_34 : f32 to vector<8x128xf32>
    %63 = arith.cmpf ogt, %60, %62 : vector<8x128xf32>
    %cst_35 = arith.constant 0.000000e+00 : f32
    %64 = vector.broadcast %cst_35 : f32 to vector<8x128xf32>
    %65 = arith.select %63, %64, %56 : vector<8x128xi1>, vector<8x128xf32>
    %c32 = arith.constant 32 : index
    %c0_36 = arith.constant 0 : index
    %66 = vector.load %arg6[%c32, %c0_36] : memref<96x128xf32, #tpu.memory_space<vmem>>, vector<8x128xf32>
    %67 = arith.subf %66, %65 : vector<8x128xf32>
    %cst_37 = arith.constant 5.000000e-01 : f32
    %68 = vector.broadcast %cst_37 : f32 to vector<8x128xf32>
    %69 = arith.mulf %67, %68 : vector<8x128xf32>
    %70 = arith.addf %65, %69 : vector<8x128xf32>
    %cst_38 = arith.constant 1.000000e+00 : f32
    %71 = vector.broadcast %cst_38 : f32 to vector<8x128xf32>
    %72 = arith.cmpf oge, %70, %71 : vector<8x128xf32>
    %73 = arith.extui %72 : vector<8x128xi1> to vector<8x128xi32>
    %74 = arith.sitofp %73 : vector<8x128xi32> to vector<8x128xf32>
    %c32_39 = arith.constant 32 : index
    %c0_40 = arith.constant 0 : index
    %75 = vector.load %arg6[%c32_39, %c0_40] : memref<96x128xf32, #tpu.memory_space<vmem>>, vector<8x128xf32>
    tpu.vector_store %arg6[%c32_39, %c0_40], %74 {strides = array<i32>} : memref<96x128xf32, #tpu.memory_space<vmem>>, vector<8x128xf32>,
    %cst_41 = arith.constant 0.000000e+00 : f32
    %76 = vector.broadcast %cst_41 : f32 to vector<8x128xf32>
    %77 = arith.cmpf ogt, %74, %76 : vector<8x128xf32>
    %cst_42 = arith.constant 0.000000e+00 : f32
    %78 = vector.broadcast %cst_42 : f32 to vector<8x128xf32>
    %79 = arith.select %77, %78, %70 : vector<8x128xi1>, vector<8x128xf32>
    %c40 = arith.constant 40 : index
    %c0_43 = arith.constant 0 : index
    %80 = vector.load %arg6[%c40, %c0_43] : memref<96x128xf32, #tpu.memory_space<vmem>>, vector<8x128xf32>
    %81 = arith.subf %80, %79 : vector<8x128xf32>
    %cst_44 = arith.constant 5.000000e-01 : f32
    %82 = vector.broadcast %cst_44 : f32 to vector<8x128xf32>
    %83 = arith.mulf %81, %82 : vector<8x128xf32>
    %84 = arith.addf %79, %83 : vector<8x128xf32>
    %cst_45 = arith.constant 1.000000e+00 : f32
    %85 = vector.broadcast %cst_45 : f32 to vector<8x128xf32>
    %86 = arith.cmpf oge, %84, %85 : vector<8x128xf32>
    %87 = arith.extui %86 : vector<8x128xi1> to vector<8x128xi32>
    %88 = arith.sitofp %87 : vector<8x128xi32> to vector<8x128xf32>
    %c40_46 = arith.constant 40 : index
    %c0_47 = arith.constant 0 : index
    %89 = vector.load %arg6[%c40_46, %c0_47] : memref<96x128xf32, #tpu.memory_space<vmem>>, vector<8x128xf32>
    tpu.vector_store %arg6[%c40_46, %c0_47], %88 {strides = array<i32>} : memref<96x128xf32, #tpu.memory_space<vmem>>, vector<8x128xf32>,
    %cst_48 = arith.constant 0.000000e+00 : f32
    %90 = vector.broadcast %cst_48 : f32 to vector<8x128xf32>
    %91 = arith.cmpf ogt, %88, %90 : vector<8x128xf32>
    %cst_49 = arith.constant 0.000000e+00 : f32
    %92 = vector.broadcast %cst_49 : f32 to vector<8x128xf32>
    %93 = arith.select %91, %92, %84 : vector<8x128xi1>, vector<8x128xf32>
    %c48 = arith.constant 48 : index
    %c0_50 = arith.constant 0 : index
    %94 = vector.load %arg6[%c48, %c0_50] : memref<96x128xf32, #tpu.memory_space<vmem>>, vector<8x128xf32>
    %95 = arith.subf %94, %93 : vector<8x128xf32>
    %cst_51 = arith.constant 5.000000e-01 : f32
    %96 = vector.broadcast %cst_51 : f32 to vector<8x128xf32>
    %97 = arith.mulf %95, %96 : vector<8x128xf32>
    %98 = arith.addf %93, %97 : vector<8x128xf32>
    %cst_52 = arith.constant 1.000000e+00 : f32
    %99 = vector.broadcast %cst_52 : f32 to vector<8x128xf32>
    %100 = arith.cmpf oge, %98, %99 : vector<8x128xf32>
    %101 = arith.extui %100 : vector<8x128xi1> to vector<8x128xi32>
    %102 = arith.sitofp %101 : vector<8x128xi32> to vector<8x128xf32>
    %c48_53 = arith.constant 48 : index
    %c0_54 = arith.constant 0 : index
    %103 = vector.load %arg6[%c48_53, %c0_54] : memref<96x128xf32, #tpu.memory_space<vmem>>, vector<8x128xf32>
    tpu.vector_store %arg6[%c48_53, %c0_54], %102 {strides = array<i32>} : memref<96x128xf32, #tpu.memory_space<vmem>>, vector<8x128xf32>,
    %cst_55 = arith.constant 0.000000e+00 : f32
    %104 = vector.broadcast %cst_55 : f32 to vector<8x128xf32>
    %105 = arith.cmpf ogt, %102, %104 : vector<8x128xf32>
    %cst_56 = arith.constant 0.000000e+00 : f32
    %106 = vector.broadcast %cst_56 : f32 to vector<8x128xf32>
    %107 = arith.select %105, %106, %98 : vector<8x128xi1>, vector<8x128xf32>
    %c56 = arith.constant 56 : index
    %c0_57 = arith.constant 0 : index
    %108 = vector.load %arg6[%c56, %c0_57] : memref<96x128xf32, #tpu.memory_space<vmem>>, vector<8x128xf32>
    %109 = arith.subf %108, %107 : vector<8x128xf32>
    %cst_58 = arith.constant 5.000000e-01 : f32
    %110 = vector.broadcast %cst_58 : f32 to vector<8x128xf32>
    %111 = arith.mulf %109, %110 : vector<8x128xf32>
    %112 = arith.addf %107, %111 : vector<8x128xf32>
    %cst_59 = arith.constant 1.000000e+00 : f32
    %113 = vector.broadcast %cst_59 : f32 to vector<8x128xf32>
    %114 = arith.cmpf oge, %112, %113 : vector<8x128xf32>
    %115 = arith.extui %114 : vector<8x128xi1> to vector<8x128xi32>
    %116 = arith.sitofp %115 : vector<8x128xi32> to vector<8x128xf32>
    %c56_60 = arith.constant 56 : index
    %c0_61 = arith.constant 0 : index
    %117 = vector.load %arg6[%c56_60, %c0_61] : memref<96x128xf32, #tpu.memory_space<vmem>>, vector<8x128xf32>
    tpu.vector_store %arg6[%c56_60, %c0_61], %116 {strides = array<i32>} : memref<96x128xf32, #tpu.memory_space<vmem>>, vector<8x128xf32>,
    %cst_62 = arith.constant 0.000000e+00 : f32
    %118 = vector.broadcast %cst_62 : f32 to vector<8x128xf32>
    %119 = arith.cmpf ogt, %116, %118 : vector<8x128xf32>
    %cst_63 = arith.constant 0.000000e+00 : f32
    %120 = vector.broadcast %cst_63 : f32 to vector<8x128xf32>
    %121 = arith.select %119, %120, %112 : vector<8x128xi1>, vector<8x128xf32>
    %c64 = arith.constant 64 : index
    %c0_64 = arith.constant 0 : index
    %122 = vector.load %arg6[%c64, %c0_64] : memref<96x128xf32, #tpu.memory_space<vmem>>, vector<8x128xf32>
    %123 = arith.subf %122, %121 : vector<8x128xf32>
    %cst_65 = arith.constant 5.000000e-01 : f32
    %124 = vector.broadcast %cst_65 : f32 to vector<8x128xf32>
    %125 = arith.mulf %123, %124 : vector<8x128xf32>
    %126 = arith.addf %121, %125 : vector<8x128xf32>
    %cst_66 = arith.constant 1.000000e+00 : f32
    %127 = vector.broadcast %cst_66 : f32 to vector<8x128xf32>
    %128 = arith.cmpf oge, %126, %127 : vector<8x128xf32>
    %129 = arith.extui %128 : vector<8x128xi1> to vector<8x128xi32>
    %130 = arith.sitofp %129 : vector<8x128xi32> to vector<8x128xf32>
    %c64_67 = arith.constant 64 : index
    %c0_68 = arith.constant 0 : index
    %131 = vector.load %arg6[%c64_67, %c0_68] : memref<96x128xf32, #tpu.memory_space<vmem>>, vector<8x128xf32>
    tpu.vector_store %arg6[%c64_67, %c0_68], %130 {strides = array<i32>} : memref<96x128xf32, #tpu.memory_space<vmem>>, vector<8x128xf32>,
    %cst_69 = arith.constant 0.000000e+00 : f32
    %132 = vector.broadcast %cst_69 : f32 to vector<8x128xf32>
    %133 = arith.cmpf ogt, %130, %132 : vector<8x128xf32>
    %cst_70 = arith.constant 0.000000e+00 : f32
    %134 = vector.broadcast %cst_70 : f32 to vector<8x128xf32>
    %135 = arith.select %133, %134, %126 : vector<8x128xi1>, vector<8x128xf32>
    %c72 = arith.constant 72 : index
    %c0_71 = arith.constant 0 : index
    %136 = vector.load %arg6[%c72, %c0_71] : memref<96x128xf32, #tpu.memory_space<vmem>>, vector<8x128xf32>
    %137 = arith.subf %136, %135 : vector<8x128xf32>
    %cst_72 = arith.constant 5.000000e-01 : f32
    %138 = vector.broadcast %cst_72 : f32 to vector<8x128xf32>
    %139 = arith.mulf %137, %138 : vector<8x128xf32>
    %140 = arith.addf %135, %139 : vector<8x128xf32>
    %cst_73 = arith.constant 1.000000e+00 : f32
    %141 = vector.broadcast %cst_73 : f32 to vector<8x128xf32>
    %142 = arith.cmpf oge, %140, %141 : vector<8x128xf32>
    %143 = arith.extui %142 : vector<8x128xi1> to vector<8x128xi32>
    %144 = arith.sitofp %143 : vector<8x128xi32> to vector<8x128xf32>
    %c72_74 = arith.constant 72 : index
    %c0_75 = arith.constant 0 : index
    %145 = vector.load %arg6[%c72_74, %c0_75] : memref<96x128xf32, #tpu.memory_space<vmem>>, vector<8x128xf32>
    tpu.vector_store %arg6[%c72_74, %c0_75], %144 {strides = array<i32>} : memref<96x128xf32, #tpu.memory_space<vmem>>, vector<8x128xf32>,
    %cst_76 = arith.constant 0.000000e+00 : f32
    %146 = vector.broadcast %cst_76 : f32 to vector<8x128xf32>
    %147 = arith.cmpf ogt, %144, %146 : vector<8x128xf32>
    %cst_77 = arith.constant 0.000000e+00 : f32
    %148 = vector.broadcast %cst_77 : f32 to vector<8x128xf32>
    %149 = arith.select %147, %148, %140 : vector<8x128xi1>, vector<8x128xf32>
    %c80 = arith.constant 80 : index
    %c0_78 = arith.constant 0 : index
    %150 = vector.load %arg6[%c80, %c0_78] : memref<96x128xf32, #tpu.memory_space<vmem>>, vector<8x128xf32>
    %151 = arith.subf %150, %149 : vector<8x128xf32>
    %cst_79 = arith.constant 5.000000e-01 : f32
    %152 = vector.broadcast %cst_79 : f32 to vector<8x128xf32>
    %153 = arith.mulf %151, %152 : vector<8x128xf32>
    %154 = arith.addf %149, %153 : vector<8x128xf32>
    %cst_80 = arith.constant 1.000000e+00 : f32
    %155 = vector.broadcast %cst_80 : f32 to vector<8x128xf32>
    %156 = arith.cmpf oge, %154, %155 : vector<8x128xf32>
    %157 = arith.extui %156 : vector<8x128xi1> to vector<8x128xi32>
    %158 = arith.sitofp %157 : vector<8x128xi32> to vector<8x128xf32>
    %c80_81 = arith.constant 80 : index
    %c0_82 = arith.constant 0 : index
    %159 = vector.load %arg6[%c80_81, %c0_82] : memref<96x128xf32, #tpu.memory_space<vmem>>, vector<8x128xf32>
    tpu.vector_store %arg6[%c80_81, %c0_82], %158 {strides = array<i32>} : memref<96x128xf32, #tpu.memory_space<vmem>>, vector<8x128xf32>,
    %cst_83 = arith.constant 0.000000e+00 : f32
    %160 = vector.broadcast %cst_83 : f32 to vector<8x128xf32>
    %161 = arith.cmpf ogt, %158, %160 : vector<8x128xf32>
    %cst_84 = arith.constant 0.000000e+00 : f32
    %162 = vector.broadcast %cst_84 : f32 to vector<8x128xf32>
    %163 = arith.select %161, %162, %154 : vector<8x128xi1>, vector<8x128xf32>
    %c88 = arith.constant 88 : index
    %c0_85 = arith.constant 0 : index
    %164 = vector.load %arg6[%c88, %c0_85] : memref<96x128xf32, #tpu.memory_space<vmem>>, vector<8x128xf32>
    %165 = arith.subf %164, %163 : vector<8x128xf32>
    %cst_86 = arith.constant 5.000000e-01 : f32
    %166 = vector.broadcast %cst_86 : f32 to vector<8x128xf32>
    %167 = arith.mulf %165, %166 : vector<8x128xf32>
    %168 = arith.addf %163, %167 : vector<8x128xf32>
    %cst_87 = arith.constant 1.000000e+00 : f32
    %169 = vector.broadcast %cst_87 : f32 to vector<8x128xf32>
    %170 = arith.cmpf oge, %168, %169 : vector<8x128xf32>
    %171 = arith.extui %170 : vector<8x128xi1> to vector<8x128xi32>
    %172 = arith.sitofp %171 : vector<8x128xi32> to vector<8x128xf32>
    %c88_88 = arith.constant 88 : index
    %c0_89 = arith.constant 0 : index
    %173 = vector.load %arg6[%c88_88, %c0_89] : memref<96x128xf32, #tpu.memory_space<vmem>>, vector<8x128xf32>
    tpu.vector_store %arg6[%c88_88, %c0_89], %172 {strides = array<i32>} : memref<96x128xf32, #tpu.memory_space<vmem>>, vector<8x128xf32>,
    %c0_90 = arith.constant 0 : index
    %c0_91 = arith.constant 0 : index
    %174 = vector.load %arg6[%c0_90, %c0_91] : memref<96x128xf32, #tpu.memory_space<vmem>>, vector<96x128xf32>
    %c0_92 = arith.constant 0 : index
    %c0_93 = arith.constant 0 : index
    %175 = vector.load %arg3[%c0_92, %c0_93] : memref<128x128xf32, #tpu.memory_space<vmem>>, vector<128x128xf32>
    %cst_94 = arith.constant dense<0.000000e+00> : vector<96x128xf32>
    %176 = tpu.matmul %174, %175, %cst_94 {dimension_numbers = #tpu.dot_dimension_numbers<[1], [0], [0], [1], [0, 0, 1, 1], [], []>} : vector<96x128xf32>, vector<128x128xf32>, vector<96x128xf32> -> vector<96x128xf32>
    %c0_95 = arith.constant 0 : index
    %c0_96 = arith.constant 0 : index
    %177 = vector.load %arg4[%c0_95, %c0_96] : memref<1x128xf32, #tpu.memory_space<vmem>>, vector<1x128xf32>
    %178 = vector.broadcast %177 : vector<1x128xf32> to vector<96x128xf32>
    %179 = arith.addf %176, %178 : vector<96x128xf32>
    %cst_97 = arith.constant 0.000000e+00 : f32
    %180 = vector.broadcast %cst_97 : f32 to vector<8x128xf32>
    %cst_98 = arith.constant 0.000000e+00 : f32
    %181 = vector.broadcast %cst_98 : f32 to vector<8x128xf32>
    %182 = vector.extract_strided_slice %179 {offsets = [0, 0], sizes = [8, 128], strides = [1, 1]} : vector<96x128xf32> to vector<8x128xf32>
    %183 = arith.subf %182, %180 : vector<8x128xf32>
    %cst_99 = arith.constant 5.000000e-01 : f32
    %184 = vector.broadcast %cst_99 : f32 to vector<8x128xf32>
    %185 = arith.mulf %183, %184 : vector<8x128xf32>
    %186 = arith.addf %180, %185 : vector<8x128xf32>
    %cst_100 = arith.constant 1.000000e+00 : f32
    %187 = vector.broadcast %cst_100 : f32 to vector<8x128xf32>
    %188 = arith.cmpf oge, %186, %187 : vector<8x128xf32>
    %189 = arith.extui %188 : vector<8x128xi1> to vector<8x128xi32>
    %190 = arith.sitofp %189 : vector<8x128xi32> to vector<8x128xf32>
    %cst_101 = arith.constant 0.000000e+00 : f32
    %191 = vector.broadcast %cst_101 : f32 to vector<8x128xf32>
    %192 = arith.cmpf ogt, %190, %191 : vector<8x128xf32>
    %cst_102 = arith.constant 0.000000e+00 : f32
    %193 = vector.broadcast %cst_102 : f32 to vector<8x128xf32>
    %194 = arith.select %192, %193, %186 : vector<8x128xi1>, vector<8x128xf32>
    %195 = vector.extract_strided_slice %179 {offsets = [8, 0], sizes = [8, 128], strides = [1, 1]} : vector<96x128xf32> to vector<8x128xf32>
    %196 = arith.subf %195, %194 : vector<8x128xf32>
    %cst_103 = arith.constant 5.000000e-01 : f32
    %197 = vector.broadcast %cst_103 : f32 to vector<8x128xf32>
    %198 = arith.mulf %196, %197 : vector<8x128xf32>
    %199 = arith.addf %194, %198 : vector<8x128xf32>
    %cst_104 = arith.constant 1.000000e+00 : f32
    %200 = vector.broadcast %cst_104 : f32 to vector<8x128xf32>
    %201 = arith.cmpf oge, %199, %200 : vector<8x128xf32>
    %202 = arith.extui %201 : vector<8x128xi1> to vector<8x128xi32>
    %203 = arith.sitofp %202 : vector<8x128xi32> to vector<8x128xf32>
    %cst_105 = arith.constant 0.000000e+00 : f32
    %204 = vector.broadcast %cst_105 : f32 to vector<8x128xf32>
    %205 = arith.cmpf ogt, %203, %204 : vector<8x128xf32>
    %cst_106 = arith.constant 0.000000e+00 : f32
    %206 = vector.broadcast %cst_106 : f32 to vector<8x128xf32>
    %207 = arith.select %205, %206, %199 : vector<8x128xi1>, vector<8x128xf32>
    %208 = vector.extract_strided_slice %179 {offsets = [16, 0], sizes = [8, 128], strides = [1, 1]} : vector<96x128xf32> to vector<8x128xf32>
    %209 = arith.subf %208, %207 : vector<8x128xf32>
    %cst_107 = arith.constant 5.000000e-01 : f32
    %210 = vector.broadcast %cst_107 : f32 to vector<8x128xf32>
    %211 = arith.mulf %209, %210 : vector<8x128xf32>
    %212 = arith.addf %207, %211 : vector<8x128xf32>
    %cst_108 = arith.constant 1.000000e+00 : f32
    %213 = vector.broadcast %cst_108 : f32 to vector<8x128xf32>
    %214 = arith.cmpf oge, %212, %213 : vector<8x128xf32>
    %215 = arith.extui %214 : vector<8x128xi1> to vector<8x128xi32>
    %216 = arith.sitofp %215 : vector<8x128xi32> to vector<8x128xf32>
    %cst_109 = arith.constant 0.000000e+00 : f32
    %217 = vector.broadcast %cst_109 : f32 to vector<8x128xf32>
    %218 = arith.cmpf ogt, %216, %217 : vector<8x128xf32>
    %cst_110 = arith.constant 0.000000e+00 : f32
    %219 = vector.broadcast %cst_110 : f32 to vector<8x128xf32>
    %220 = arith.select %218, %219, %212 : vector<8x128xi1>, vector<8x128xf32>
    %221 = vector.extract_strided_slice %179 {offsets = [24, 0], sizes = [8, 128], strides = [1, 1]} : vector<96x128xf32> to vector<8x128xf32>
    %222 = arith.subf %221, %220 : vector<8x128xf32>
    %cst_111 = arith.constant 5.000000e-01 : f32
    %223 = vector.broadcast %cst_111 : f32 to vector<8x128xf32>
    %224 = arith.mulf %222, %223 : vector<8x128xf32>
    %225 = arith.addf %220, %224 : vector<8x128xf32>
    %cst_112 = arith.constant 1.000000e+00 : f32
    %226 = vector.broadcast %cst_112 : f32 to vector<8x128xf32>
    %227 = arith.cmpf oge, %225, %226 : vector<8x128xf32>
    %228 = arith.extui %227 : vector<8x128xi1> to vector<8x128xi32>
    %229 = arith.sitofp %228 : vector<8x128xi32> to vector<8x128xf32>
    %cst_113 = arith.constant 0.000000e+00 : f32
    %230 = vector.broadcast %cst_113 : f32 to vector<8x128xf32>
    %231 = arith.cmpf ogt, %229, %230 : vector<8x128xf32>
    %cst_114 = arith.constant 0.000000e+00 : f32
    %232 = vector.broadcast %cst_114 : f32 to vector<8x128xf32>
    %233 = arith.select %231, %232, %225 : vector<8x128xi1>, vector<8x128xf32>
    %234 = vector.extract_strided_slice %179 {offsets = [32, 0], sizes = [8, 128], strides = [1, 1]} : vector<96x128xf32> to vector<8x128xf32>
    %235 = arith.subf %234, %233 : vector<8x128xf32>
    %cst_115 = arith.constant 5.000000e-01 : f32
    %236 = vector.broadcast %cst_115 : f32 to vector<8x128xf32>
    %237 = arith.mulf %235, %236 : vector<8x128xf32>
    %238 = arith.addf %233, %237 : vector<8x128xf32>
    %cst_116 = arith.constant 1.000000e+00 : f32
    %239 = vector.broadcast %cst_116 : f32 to vector<8x128xf32>
    %240 = arith.cmpf oge, %238, %239 : vector<8x128xf32>
    %241 = arith.extui %240 : vector<8x128xi1> to vector<8x128xi32>
    %242 = arith.sitofp %241 : vector<8x128xi32> to vector<8x128xf32>
    %cst_117 = arith.constant 0.000000e+00 : f32
    %243 = vector.broadcast %cst_117 : f32 to vector<8x128xf32>
    %244 = arith.cmpf ogt, %242, %243 : vector<8x128xf32>
    %cst_118 = arith.constant 0.000000e+00 : f32
    %245 = vector.broadcast %cst_118 : f32 to vector<8x128xf32>
    %246 = arith.select %244, %245, %238 : vector<8x128xi1>, vector<8x128xf32>
    %247 = vector.extract_strided_slice %179 {offsets = [40, 0], sizes = [8, 128], strides = [1, 1]} : vector<96x128xf32> to vector<8x128xf32>
    %248 = arith.subf %247, %246 : vector<8x128xf32>
    %cst_119 = arith.constant 5.000000e-01 : f32
    %249 = vector.broadcast %cst_119 : f32 to vector<8x128xf32>
    %250 = arith.mulf %248, %249 : vector<8x128xf32>
    %251 = arith.addf %246, %250 : vector<8x128xf32>
    %cst_120 = arith.constant 1.000000e+00 : f32
    %252 = vector.broadcast %cst_120 : f32 to vector<8x128xf32>
    %253 = arith.cmpf oge, %251, %252 : vector<8x128xf32>
    %254 = arith.extui %253 : vector<8x128xi1> to vector<8x128xi32>
    %255 = arith.sitofp %254 : vector<8x128xi32> to vector<8x128xf32>
    %cst_121 = arith.constant 0.000000e+00 : f32
    %256 = vector.broadcast %cst_121 : f32 to vector<8x128xf32>
    %257 = arith.cmpf ogt, %255, %256 : vector<8x128xf32>
    %cst_122 = arith.constant 0.000000e+00 : f32
    %258 = vector.broadcast %cst_122 : f32 to vector<8x128xf32>
    %259 = arith.select %257, %258, %251 : vector<8x128xi1>, vector<8x128xf32>
    %260 = vector.extract_strided_slice %179 {offsets = [48, 0], sizes = [8, 128], strides = [1, 1]} : vector<96x128xf32> to vector<8x128xf32>
    %261 = arith.subf %260, %259 : vector<8x128xf32>
    %cst_123 = arith.constant 5.000000e-01 : f32
    %262 = vector.broadcast %cst_123 : f32 to vector<8x128xf32>
    %263 = arith.mulf %261, %262 : vector<8x128xf32>
    %264 = arith.addf %259, %263 : vector<8x128xf32>
    %cst_124 = arith.constant 1.000000e+00 : f32
    %265 = vector.broadcast %cst_124 : f32 to vector<8x128xf32>
    %266 = arith.cmpf oge, %264, %265 : vector<8x128xf32>
    %267 = arith.extui %266 : vector<8x128xi1> to vector<8x128xi32>
    %268 = arith.sitofp %267 : vector<8x128xi32> to vector<8x128xf32>
    %cst_125 = arith.constant 0.000000e+00 : f32
    %269 = vector.broadcast %cst_125 : f32 to vector<8x128xf32>
    %270 = arith.cmpf ogt, %268, %269 : vector<8x128xf32>
    %cst_126 = arith.constant 0.000000e+00 : f32
    %271 = vector.broadcast %cst_126 : f32 to vector<8x128xf32>
    %272 = arith.select %270, %271, %264 : vector<8x128xi1>, vector<8x128xf32>
    %273 = vector.extract_strided_slice %179 {offsets = [56, 0], sizes = [8, 128], strides = [1, 1]} : vector<96x128xf32> to vector<8x128xf32>
    %274 = arith.subf %273, %272 : vector<8x128xf32>
    %cst_127 = arith.constant 5.000000e-01 : f32
    %275 = vector.broadcast %cst_127 : f32 to vector<8x128xf32>
    %276 = arith.mulf %274, %275 : vector<8x128xf32>
    %277 = arith.addf %272, %276 : vector<8x128xf32>
    %cst_128 = arith.constant 1.000000e+00 : f32
    %278 = vector.broadcast %cst_128 : f32 to vector<8x128xf32>
    %279 = arith.cmpf oge, %277, %278 : vector<8x128xf32>
    %280 = arith.extui %279 : vector<8x128xi1> to vector<8x128xi32>
    %281 = arith.sitofp %280 : vector<8x128xi32> to vector<8x128xf32>
    %cst_129 = arith.constant 0.000000e+00 : f32
    %282 = vector.broadcast %cst_129 : f32 to vector<8x128xf32>
    %283 = arith.cmpf ogt, %281, %282 : vector<8x128xf32>
    %cst_130 = arith.constant 0.000000e+00 : f32
    %284 = vector.broadcast %cst_130 : f32 to vector<8x128xf32>
    %285 = arith.select %283, %284, %277 : vector<8x128xi1>, vector<8x128xf32>
    %286 = vector.extract_strided_slice %179 {offsets = [64, 0], sizes = [8, 128], strides = [1, 1]} : vector<96x128xf32> to vector<8x128xf32>
    %287 = arith.subf %286, %285 : vector<8x128xf32>
    %cst_131 = arith.constant 5.000000e-01 : f32
    %288 = vector.broadcast %cst_131 : f32 to vector<8x128xf32>
    %289 = arith.mulf %287, %288 : vector<8x128xf32>
    %290 = arith.addf %285, %289 : vector<8x128xf32>
    %cst_132 = arith.constant 1.000000e+00 : f32
    %291 = vector.broadcast %cst_132 : f32 to vector<8x128xf32>
    %292 = arith.cmpf oge, %290, %291 : vector<8x128xf32>
    %293 = arith.extui %292 : vector<8x128xi1> to vector<8x128xi32>
    %294 = arith.sitofp %293 : vector<8x128xi32> to vector<8x128xf32>
    %cst_133 = arith.constant 0.000000e+00 : f32
    %295 = vector.broadcast %cst_133 : f32 to vector<8x128xf32>
    %296 = arith.cmpf ogt, %294, %295 : vector<8x128xf32>
    %cst_134 = arith.constant 0.000000e+00 : f32
    %297 = vector.broadcast %cst_134 : f32 to vector<8x128xf32>
    %298 = arith.select %296, %297, %290 : vector<8x128xi1>, vector<8x128xf32>
    %299 = arith.addf %181, %294 : vector<8x128xf32>
    %300 = vector.extract_strided_slice %179 {offsets = [72, 0], sizes = [8, 128], strides = [1, 1]} : vector<96x128xf32> to vector<8x128xf32>
    %301 = arith.subf %300, %298 : vector<8x128xf32>
    %cst_135 = arith.constant 5.000000e-01 : f32
    %302 = vector.broadcast %cst_135 : f32 to vector<8x128xf32>
    %303 = arith.mulf %301, %302 : vector<8x128xf32>
    %304 = arith.addf %298, %303 : vector<8x128xf32>
    %cst_136 = arith.constant 1.000000e+00 : f32
    %305 = vector.broadcast %cst_136 : f32 to vector<8x128xf32>
    %306 = arith.cmpf oge, %304, %305 : vector<8x128xf32>
    %307 = arith.extui %306 : vector<8x128xi1> to vector<8x128xi32>
    %308 = arith.sitofp %307 : vector<8x128xi32> to vector<8x128xf32>
    %cst_137 = arith.constant 0.000000e+00 : f32
    %309 = vector.broadcast %cst_137 : f32 to vector<8x128xf32>
    %310 = arith.cmpf ogt, %308, %309 : vector<8x128xf32>
    %cst_138 = arith.constant 0.000000e+00 : f32
    %311 = vector.broadcast %cst_138 : f32 to vector<8x128xf32>
    %312 = arith.select %310, %311, %304 : vector<8x128xi1>, vector<8x128xf32>
    %313 = arith.addf %299, %308 : vector<8x128xf32>
    %314 = vector.extract_strided_slice %179 {offsets = [80, 0], sizes = [8, 128], strides = [1, 1]} : vector<96x128xf32> to vector<8x128xf32>
    %315 = arith.subf %314, %312 : vector<8x128xf32>
    %cst_139 = arith.constant 5.000000e-01 : f32
    %316 = vector.broadcast %cst_139 : f32 to vector<8x128xf32>
    %317 = arith.mulf %315, %316 : vector<8x128xf32>
    %318 = arith.addf %312, %317 : vector<8x128xf32>
    %cst_140 = arith.constant 1.000000e+00 : f32
    %319 = vector.broadcast %cst_140 : f32 to vector<8x128xf32>
    %320 = arith.cmpf oge, %318, %319 : vector<8x128xf32>
    %321 = arith.extui %320 : vector<8x128xi1> to vector<8x128xi32>
    %322 = arith.sitofp %321 : vector<8x128xi32> to vector<8x128xf32>
    %cst_141 = arith.constant 0.000000e+00 : f32
    %323 = vector.broadcast %cst_141 : f32 to vector<8x128xf32>
    %324 = arith.cmpf ogt, %322, %323 : vector<8x128xf32>
    %cst_142 = arith.constant 0.000000e+00 : f32
    %325 = vector.broadcast %cst_142 : f32 to vector<8x128xf32>
    %326 = arith.select %324, %325, %318 : vector<8x128xi1>, vector<8x128xf32>
    %327 = arith.addf %313, %322 : vector<8x128xf32>
    %328 = vector.extract_strided_slice %179 {offsets = [88, 0], sizes = [8, 128], strides = [1, 1]} : vector<96x128xf32> to vector<8x128xf32>
    %329 = arith.subf %328, %326 : vector<8x128xf32>
    %cst_143 = arith.constant 5.000000e-01 : f32
    %330 = vector.broadcast %cst_143 : f32 to vector<8x128xf32>
    %331 = arith.mulf %329, %330 : vector<8x128xf32>
    %332 = arith.addf %326, %331 : vector<8x128xf32>
    %cst_144 = arith.constant 1.000000e+00 : f32
    %333 = vector.broadcast %cst_144 : f32 to vector<8x128xf32>
    %334 = arith.cmpf oge, %332, %333 : vector<8x128xf32>
    %335 = arith.extui %334 : vector<8x128xi1> to vector<8x128xi32>
    %336 = arith.sitofp %335 : vector<8x128xi32> to vector<8x128xf32>
    %337 = arith.addf %327, %336 : vector<8x128xf32>
    %c0_145 = arith.constant 0 : index
    %c0_146 = arith.constant 0 : index
    %338 = vector.load %arg5[%c0_145, %c0_146] : memref<8x128xf32, #tpu.memory_space<vmem>>, vector<8x128xf32>
    tpu.vector_store %arg5[%c0_145, %c0_146], %337 {strides = array<i32>} : memref<8x128xf32, #tpu.memory_space<vmem>>, vector<8x128xf32>,
    return
  }
}

</mosaic_0001>

<bundles_post_ra>
// kernel: tpu_custom_call.1
= control target key start
LH: loop header
LB: loop body
LE: loop exit
PB: predicated region body
PF: predicated region fallthrough
CT: control target
= control target key end

     0   :  { %10 = vsyncpa [#allocation4], 0  ;;  %s799_s0 = inlined_call_operand.vmem [shape: f32[96,1], index: 0, kind: input, shape index: {}]   ;;  %s800_s1 = inlined_call_operand.vmem [shape: f32[1,128], index: 1, kind: input, shape index: {}]   ;;  %s801_s2 = inlined_call_operand.vmem [shape: f32[1,128], index: 2, kind: input, shape index: {}]   ;;  %s802_s3 = inlined_call_operand.hbm [shape: f32[128,128], index: 3, kind: input, shape index: {}]   ;;  %s803_s4 = inlined_call_operand.vmem [shape: f32[1,128], index: 4, kind: input, shape index: {}]   ;;  %s804_s5 = inlined_call_operand.hbm [shape: f32[8,128], index: 5, kind: output, shape index: {}]  }
   0x1   :  { %11 = vsyncpa [#allocation5], 0  ;;  %s22_s20 = sshll.u32 %s802_s3, 4  ;;  %s619_s21 = smov [#allocation3]   ;;  %s23_s20 = int_to_ptr.hbm [resolvable:$true] %s22_s20 }
   0x2   :  { %s24_s22 = sshll.u32 %s619_s21, 4  ;;  %s620_s23 = smov 128   ;;  %s25_s22 = int_to_ptr.vmem [resolvable:$true] %s24_s22 }
   0x3   :  { %s621_s24 = smov 8  }
   0x4   :  { %30 = dma.hbm_to_vmem [thread:$0]  %s23_s20, 2048, %s25_s22, [#allocation4], %s620_s23, %s620_s23, %s621_s24  }
   0x5   :  { %615 = dma.done.wait [#allocation4], 2048  }
   0x6   :  { %616 = vsyncadd [#allocation4], 4294965248  ;;  %v622_v0 = vmov 0   ;;  %v39_v1 = vld [vmem:[%s799_s0 + $0x10] sm:$0xff]  ;;  %v37_v2 = vld [vmem:[%s799_s0] sm:$0xff]  ;;  %v623_v44 = vmov 0.0  }
   0x7   :  { %562 = vset.pattern.permute.xlu1 %v622_v0  ;;  %561 = vset.pattern.permute.xlu0 %v622_v0  ;;  %v41_v3 = vld [vmem:[%s799_s0 + $0x20] sm:$0xff]  ;;  %v297_v4 = vld [vmem:[#allocation3 + $0x78] sm:$0xff]  ;;  %v296_v5 = vld [vmem:[#allocation3 + $0x70] sm:$0xff]  ;;  %v624_v46 = vmov 1.0   ;;  %s460_s3 = sshll.u32 %s804_s5, 4  ;;  %s461_s3 = int_to_ptr.hbm [resolvable:$true] %s460_s3 }
   0x8   :  { %563 = vset.pattern.permute.xlu2 %v622_v0  ;;  %62 = vperm.xlu1 %562, %v39_v1   ;;  %v40_v6 = vld [vmem:[%s799_s0 + $0x18] sm:$0xff]  ;;  %v38_v7 = vld [vmem:[%s799_s0 + $0x8] sm:$0xff]  ;;  %v294_v10 = vld [vmem:[#allocation3 + $0x60] sm:$0xff] }
   0x9   :  { %52 = vperm.xlu0 %561, %v37_v2   ;;  %72 = vperm.xlu2 %563, %v41_v3   ;;  %v295_v8 = vld [vmem:[#allocation3 + $0x68] sm:$0xff]  ;;  %v293_v11 = vld [vmem:[#allocation3 + $0x58] sm:$0xff]  ;;  %v292_v12 = vld [vmem:[#allocation3 + $0x50] sm:$0xff] }
   0xa   :  { %302 = vmatpush.msra.mxu0 %v297_v4  ;;  %506 = vmatpush.msra.mxu1 %v297_v4  ;;  %v42_v9 = vld [vmem:[%s799_s0 + $0x28] sm:$0xff]  ;;  %v44_v13 = vld [vmem:[%s799_s0 + $0x38] sm:$0xff]  ;;  %v43_v14 = vld [vmem:[%s799_s0 + $0x30] sm:$0xff] }
   0xb   :  { %507 = vmatpush.msra.mxu2 %v297_v4  ;;  %508 = vmatpush.msra.mxu3 %v297_v4  ;;  %v291_v15 = vld [vmem:[#allocation3 + $0x48] sm:$0xff]  ;;  %v45_v16 = vld [vmem:[%s799_s0 + $0x40] sm:$0xff]  ;;  %v289_v18 = vld [vmem:[#allocation3 + $0x38] sm:$0xff] }
   0xc   :  { %303 = vmatpush.msra.mxu0 %v296_v5  ;;  %509 = vmatpush.msra.mxu1 %v296_v5  ;;  %v290_v17 = vld [vmem:[#allocation3 + $0x40] sm:$0xff]  ;;  %v288_v19 = vld [vmem:[#allocation3 + $0x30] sm:$0xff]  ;;  %v46_v21 = vld [vmem:[%s799_s0 + $0x48] sm:$0xff] }
   0xd   :  { %510 = vmatpush.msra.mxu2 %v296_v5  ;;  %511 = vmatpush.msra.mxu3 %v296_v5  ;;  %v47_v20 = vld [vmem:[%s799_s0 + $0x50] sm:$0xff]  ;;  %v287_v22 = vld [vmem:[#allocation3 + $0x28] sm:$0xff]  ;;  %v48_v23 = vld [vmem:[%s799_s0 + $0x58] sm:$0xff] }
   0xe   :  { %304 = vmatpush.msra.mxu0 %v295_v8  ;;  %512 = vmatpush.msra.mxu1 %v295_v8  ;;  %v286_v24 = vld [vmem:[#allocation3 + $0x20] sm:$0xff]  ;;  %v285_v25 = vld [vmem:[#allocation3 + $0x18] sm:$0xff]  ;;  %v284_v26 = vld [vmem:[#allocation3 + $0x10] sm:$0xff] }
   0xf   :  { %513 = vmatpush.msra.mxu2 %v295_v8  ;;  %514 = vmatpush.msra.mxu3 %v295_v8  ;;  %v283_v27 = vld [vmem:[#allocation3 + $0x8] sm:$0xff]  ;;  %v282_v28 = vld [vmem:[#allocation3] sm:$0xff] }
  0x10   :  { %67 = vperm.xlu1 %562, %v40_v6   ;;  %305 = vmatpush.msra.mxu0 %v294_v10  ;;  %v700_v31 = vld [vmem:[%s800_s1] ss:$0 sm:$0xff] }
  0x11   :  { %57 = vperm.xlu0 %561, %v38_v7   ;;  %77 = vperm.xlu2 %563, %v42_v9   ;;  %v705_v33 = vld [vmem:[%s801_s2] ss:$0 sm:$0xff] }
  0x12   :  { %515 = vmatpush.msra.mxu1 %v294_v10  ;;  %516 = vmatpush.msra.mxu2 %v294_v10 }
  0x13   :  { %306 = vmatpush.msra.mxu0 %v293_v11  ;;  %517 = vmatpush.msra.mxu3 %v294_v10 }
  0x14   :  { %518 = vmatpush.msra.mxu1 %v293_v11  ;;  %519 = vmatpush.msra.mxu2 %v293_v11 }
  0x15   :  { %307 = vmatpush.msra.mxu0 %v292_v12  ;;  %520 = vmatpush.msra.mxu3 %v293_v11 }
  0x16   :  { %521 = vmatpush.msra.mxu1 %v292_v12  ;;  %522 = vmatpush.msra.mxu2 %v292_v12 }
  0x17   :  { %308 = vmatpush.msra.mxu0 %v291_v15  ;;  %523 = vmatpush.msra.mxu3 %v292_v12 }
  0x18   :  { %87 = vperm.xlu1 %562, %v44_v13   ;;  %524 = vmatpush.msra.mxu1 %v291_v15 }
  0x19   :  { %82 = vperm.xlu0 %561, %v43_v14   ;;  %92 = vperm.xlu2 %563, %v45_v16  }
  0x1a   :  { %309 = vmatpush.msra.mxu0 %v290_v17  ;;  %527 = vmatpush.msra.mxu1 %v290_v17 }
  0x1b   :  { %525 = vmatpush.msra.mxu2 %v291_v15  ;;  %526 = vmatpush.msra.mxu3 %v291_v15 }
  0x1c   :  { %310 = vmatpush.msra.mxu0 %v289_v18  ;;  %530 = vmatpush.msra.mxu1 %v289_v18 }
  0x1d   :  { %528 = vmatpush.msra.mxu2 %v290_v17  ;;  %529 = vmatpush.msra.mxu3 %v290_v17 }
  0x1e   :  { %311 = vmatpush.msra.mxu0 %v288_v19  ;;  %533 = vmatpush.msra.mxu1 %v288_v19 }
  0x1f   :  { %531 = vmatpush.msra.mxu2 %v289_v18  ;;  %532 = vmatpush.msra.mxu3 %v289_v18 }
  0x20   :  { %102 = vperm.xlu1 %562, %v47_v20   ;;  %312 = vmatpush.msra.mxu0 %v287_v22 }
  0x21   :  { %97 = vperm.xlu0 %561, %v46_v21   ;;  %536 = vmatpush.msra.mxu1 %v287_v22 }
  0x22   :  { %107 = vperm.xlu2 %563, %v48_v23   ;;  %313 = vmatpush.msra.mxu0 %v286_v24 }
  0x23   :  { %539 = vmatpush.msra.mxu1 %v286_v24  ;;  %534 = vmatpush.msra.mxu2 %v288_v19 }
  0x24   :  { %535 = vmatpush.msra.mxu3 %v288_v19  ;;  %314 = vmatpush.msra.mxu0 %v285_v25 }
  0x25   :  { %537 = vmatpush.msra.mxu2 %v287_v22  ;;  %542 = vmatpush.msra.mxu1 %v285_v25 }
  0x26   :  { %538 = vmatpush.msra.mxu3 %v287_v22  ;;  %315 = vmatpush.msra.mxu0 %v284_v26 }
  0x27   :  { %540 = vmatpush.msra.mxu2 %v286_v24  ;;  %545 = vmatpush.msra.mxu1 %v284_v26 }
  0x28   :  { %541 = vmatpush.msra.mxu3 %v286_v24  ;;  %316 = vmatpush.msra.mxu0 %v283_v27 }
  0x29   :  { %543 = vmatpush.msra.mxu2 %v285_v25  ;;  %548 = vmatpush.msra.mxu1 %v283_v27 }
  0x2a   :  { %544 = vmatpush.msra.mxu3 %v285_v25  ;;  %317 = vmatpush.msra.mxu0 %v282_v28 }
  0x2b   :  { %546 = vmatpush.msra.mxu2 %v284_v26  ;;  %551 = vmatpush.msra.mxu1 %v282_v28 }
  0x2c   :  { %547 = vmatpush.msra.mxu3 %v284_v26 }
  0x2d   :  { %549 = vmatpush.msra.mxu2 %v283_v27 }
  0x2e   :  { %550 = vmatpush.msra.mxu3 %v283_v27 }
  0x2f   :  { %552 = vmatpush.msra.mxu2 %v282_v28 }
  0x30   :  { %553 = vmatpush.msra.mxu3 %v282_v28 }
  0x63   :  { %v73_v29 = vpop.permute.xlu2 %72 }
  0x64   :  { %v117_v13 = vmul.f32 %v700_v31, %v73_v29 }
  0x66   :  { %v133_v16 = vadd.f32 %v705_v33, %v117_v13 }
  0x6b   :  { %v695_v30 = vpop.permute.xlu2 %77 }
  0x6c   :  { %v118_v21 = vmul.f32 %v700_v31, %v695_v30 }
  0x6e   :  { %v134_v24 = vadd.f32 %v705_v33, %v118_v21 }
  0x73   :  { %v93_v32 = vpop.permute.xlu2 %92 }
  0x74   :  { %v121_v34 = vmul.f32 %v700_v31, %v93_v32 }
  0x76   :  { %v710_v38 = vadd.f32 %v705_v33, %v121_v34 }
  0x7a   :  { %v63_v35 = vpop.permute.xlu1 %62 }
  0x7b   :  { %v53_v36 = vpop.permute.xlu0 %52  ;;  %v115_v53 = vmul.f32 %v700_v31, %v63_v35 }
  0x7c   :  { %v113_v37 = vmul.f32 %v700_v31, %v53_v36  ;;  %v108_v41 = vpop.permute.xlu2 %107 }
  0x7d   :  { %v124_v42 = vmul.f32 %v700_v31, %v108_v41  ;;  %v131_v59 = vadd.f32 %v705_v33, %v115_v53 }
  0x7e   :  { %v129_v39 = vadd.f32 %v705_v33, %v113_v37 }
  0x7f   :  { %v718_v49 = vadd.f32 %v705_v33, %v124_v42 }
  0x80   :  { %v154_v40 = vmul.f32 0.5, %v129_v39 }
  0x82   :  { %vm156_vm0 = vcmp.ge.f32.partialorder %v154_v40, 1.0  ;;  %v68_v43 = vpop.permute.xlu1 %67 }
  0x83   :  { %v470_v45 = vsel %vm156_vm0, 1.0, %v623_v44  ;;  %494 = vmatmul.msk.f32.vlgmr.msra.gmra.mxu0 %vm156_vm0, %v624_v46  ;;  %v58_v47 = vpop.permute.xlu0 %57  ;;  %v116_v5 = vmul.f32 %v700_v31, %v68_v43 }
  0x84   :  { %vm160_vm1 = vcmp.gt.f32.partialorder %v470_v45, 0.0  ;;  %v114_v48 = vmul.f32 %v700_v31, %v58_v47 }
  0x85   :  { %v161_v51 = vsel %vm160_vm1, 0.0, %v154_v40  ;;  %v132_v10 = vadd.f32 %v705_v33, %v116_v5 }
  0x86   :  { %v130_v50 = vadd.f32 %v705_v33, %v114_v48 }
  0x88   :  { %v163_v52 = vsub.f32 %v130_v50, %v161_v51 }
  0x8a   :  { %v164_v54 = vmul.f32 0.5, %v163_v52  ;;  %v88_v55 = vpop.permute.xlu1 %87 }
  0x8b   :  { %v83_v56 = vpop.permute.xlu0 %82  ;;  %v120_v57 = vmul.f32 %v700_v31, %v88_v55 }
  0x8c   :  { %v165_v58 = vadd.f32 %v164_v54, %v161_v51  ;;  %v119_v28 = vmul.f32 %v700_v31, %v83_v56 }
  0x8d   :  { %v136_v60 = vadd.f32 %v705_v33, %v120_v57 }
  0x8e   :  { %vm166_vm2 = vcmp.ge.f32.partialorder %v165_v58, 1.0  ;;  %v135_v30 = vadd.f32 %v705_v33, %v119_v28 }
  0x8f   :  { %v471_v61 = vsel %vm166_vm2, 1.0, %v623_v44  ;;  %495 = vmatmul.msk.f32.gmra.mxu0 %vm166_vm2, %v624_v46 }
  0x90   :  { %vm170_vm3 = vcmp.gt.f32.partialorder %v471_v61, 0.0 }
  0x91   :  { %v171_v62 = vsel %vm170_vm3, 0.0, %v165_v58 }
  0x92   :  { %v173_v63 = vsub.f32 %v131_v59, %v171_v62  ;;  %v103_v0 = vpop.permute.xlu1 %102 }
  0x93   :  { %v98_v1 = vpop.permute.xlu0 %97  ;;  %v123_v3 = vmul.f32 %v700_v31, %v103_v0  ;;  %v770_v0 = vld [vmem:[%s803_s4] ss:$0 sm:$0xff]  ;;  %s625_s4 = smov [#allocation6]  }
  0x94   :  { %v174_v2 = vmul.f32 0.5, %v173_v63  ;;  %v122_v4 = vmul.f32 %v700_v31, %v98_v1  ;;  %s458_s26 = sshll.u32 %s625_s4, 4  ;;  %s459_s26 = int_to_ptr.vmem [resolvable:$true] %s458_s26 }
  0x95   :  { %v731_v6 = vadd.f32 %v705_v33, %v123_v3 }
  0x96   :  { %v734_v7 = vadd.f32 %v705_v33, %v122_v4  ;;  %v175_v8 = vadd.f32 %v174_v2, %v171_v62 }
  0x98   :  { %vm176_vm4 = vcmp.ge.f32.partialorder %v175_v8, 1.0 }
  0x99   :  { %v472_v9 = vsel %vm176_vm4, 1.0, %v623_v44  ;;  %496 = vmatmul.msk.f32.gmra.mxu0 %vm176_vm4, %v624_v46 }
  0x9a   :  { %vm180_vm5 = vcmp.gt.f32.partialorder %v472_v9, 0.0 }
  0x9b   :  { %v181_v11 = vsel %vm180_vm5, 0.0, %v175_v8 }
  0x9c   :  { %v183_v12 = vsub.f32 %v132_v10, %v181_v11 }
  0x9e   :  { %v184_v14 = vmul.f32 0.5, %v183_v12 }
  0xa0   :  { %v185_v15 = vadd.f32 %v184_v14, %v181_v11 }
  0xa2   :  { %vm186_vm6 = vcmp.ge.f32.partialorder %v185_v15, 1.0 }
  0xa3   :  { %v473_v17 = vsel %vm186_vm6, 1.0, %v623_v44  ;;  %497 = vmatmul.msk.f32.vlgmr.msra.gmra.mxu1 %vm186_vm6, %v624_v46 }
  0xa4   :  { %vm190_vm7 = vcmp.gt.f32.partialorder %v473_v17, 0.0 }
  0xa5   :  { %v191_v18 = vsel %vm190_vm7, 0.0, %v185_v15 }
  0xa6   :  { %v193_v19 = vsub.f32 %v133_v16, %v191_v18 }
  0xa8   :  { %v194_v20 = vmul.f32 0.5, %v193_v19 }
  0xaa   :  { %v195_v22 = vadd.f32 %v194_v20, %v191_v18 }
  0xac   :  { %vm196_vm8 = vcmp.ge.f32.partialorder %v195_v22, 1.0 }
  0xad   :  { %v474_v23 = vsel %vm196_vm8, 1.0, %v623_v44  ;;  %498 = vmatmul.msk.f32.gmra.mxu1 %vm196_vm8, %v624_v46 }
  0xae   :  { %vm200_vm9 = vcmp.gt.f32.partialorder %v474_v23, 0.0 }
  0xaf   :  { %v201_v25 = vsel %vm200_vm9, 0.0, %v195_v22 }
  0xb0   :  { %v203_v26 = vsub.f32 %v134_v24, %v201_v25 }
  0xb2   :  { %v204_v27 = vmul.f32 0.5, %v203_v26 }
  0xb4   :  { %v205_v29 = vadd.f32 %v204_v27, %v201_v25 }
  0xb6   :  { %vm206_vm10 = vcmp.ge.f32.partialorder %v205_v29, 1.0 }
  0xb7   :  { %v475_v32 = vsel %vm206_vm10, 1.0, %v623_v44  ;;  %499 = vmatmul.msk.f32.gmra.mxu1 %vm206_vm10, %v624_v46 }
  0xb8   :  { %vm210_vm11 = vcmp.gt.f32.partialorder %v475_v32, 0.0 }
  0xb9   :  { %v211_v34 = vsel %vm210_vm11, 0.0, %v205_v29 }
  0xba   :  { %v213_v35 = vsub.f32 %v135_v30, %v211_v34 }
  0xbc   :  { %v214_v36 = vmul.f32 0.5, %v213_v35 }
  0xbe   :  { %v215_v37 = vadd.f32 %v214_v36, %v211_v34 }
  0xc0   :  { %vm216_vm12 = vcmp.ge.f32.partialorder %v215_v37, 1.0 }
  0xc1   :  { %v476_v39 = vsel %vm216_vm12, 1.0, %v623_v44  ;;  %500 = vmatmul.msk.f32.vlgmr.msra.gmra.mxu2 %vm216_vm12, %v624_v46 }
  0xc2   :  { %vm220_vm13 = vcmp.gt.f32.partialorder %v476_v39, 0.0 }
  0xc3   :  { %v221_v31 = vsel %vm220_vm13, 0.0, %v215_v37 }
  0xc4   :  { %v223_v40 = vsub.f32 %v136_v60, %v221_v31 }
  0xc6   :  { %v224_v41 = vmul.f32 0.5, %v223_v40 }
  0xc8   :  { %v225_v42 = vadd.f32 %v224_v41, %v221_v31 }
  0xca   :  { %vm226_vm14 = vcmp.ge.f32.partialorder %v225_v42, 1.0 }
  0xcb   :  { %v477_v43 = vsel %vm226_vm14, 1.0, %v623_v44  ;;  %501 = vmatmul.msk.f32.gmra.mxu2 %vm226_vm14, %v624_v46 }
  0xcc   :  { %vm230_vm15 = vcmp.gt.f32.partialorder %v477_v43, 0.0 }
  0xcd   :  { %v231_v33 = vsel %vm230_vm15, 0.0, %v225_v42 }
  0xce   :  { %v233_v45 = vsub.f32 %v710_v38, %v231_v33 }
  0xd0   :  { %v234_v47 = vmul.f32 0.5, %v233_v45 }
  0xd2   :  { %v235_v48 = vadd.f32 %v234_v47, %v231_v33 }
  0xd4   :  { %vm236_vm0 = vcmp.ge.f32.partialorder %v235_v48, 1.0 }
  0xd5   :  { %v478_v50 = vsel %vm236_vm0, 1.0, %v623_v44  ;;  %502 = vmatmul.msk.f32.gmra.mxu2 %vm236_vm0, %v624_v46 }
  0xd6   :  { %vm240_vm1 = vcmp.gt.f32.partialorder %v478_v50, 0.0 }
  0xd7   :  { %v241_v51 = vsel %vm240_vm1, 0.0, %v235_v48 }
  0xd8   :  { %v243_v52 = vsub.f32 %v734_v7, %v241_v51 }
  0xda   :  { %v244_v53 = vmul.f32 0.5, %v243_v52 }
  0xdc   :  { %v245_v54 = vadd.f32 %v244_v53, %v241_v51 }
  0xde   :  { %vm246_vm2 = vcmp.ge.f32.partialorder %v245_v54, 1.0 }
  0xdf   :  { %v479_v55 = vsel %vm246_vm2, 1.0, %v623_v44  ;;  %503 = vmatmul.msk.f32.vlgmr.msra.gmra.mxu3 %vm246_vm2, %v624_v46 }
  0xe0   :  { %vm250_vm3 = vcmp.gt.f32.partialorder %v479_v55, 0.0 }
  0xe1   :  { %v251_v38 = vsel %vm250_vm3, 0.0, %v245_v54 }
  0xe2   :  { %v253_v56 = vsub.f32 %v731_v6, %v251_v38 }
  0xe4   :  { %v254_v57 = vmul.f32 0.5, %v253_v56 }
  0xe6   :  { %v255_v58 = vadd.f32 %v254_v57, %v251_v38 }
  0xe8   :  { %vm256_vm4 = vcmp.ge.f32.partialorder %v255_v58, 1.0 }
  0xe9   :  { %v480_v59 = vsel %vm256_vm4, 1.0, %v623_v44  ;;  %504 = vmatmul.msk.f32.gmra.mxu3 %vm256_vm4, %v624_v46 }
  0xea   :  { %vm260_vm5 = vcmp.gt.f32.partialorder %v480_v59, 0.0 }
  0xeb   :  { %v261_v60 = vsel %vm260_vm5, 0.0, %v255_v58 }
  0xec   :  { %v263_v61 = vsub.f32 %v718_v49, %v261_v60 }
  0xee   :  { %v264_v62 = vmul.f32 0.5, %v263_v61 }
  0xf0   :  { %v265_v63 = vadd.f32 %v264_v62, %v261_v60 }
  0xf2   :  { %vm266_vm6 = vcmp.ge.f32.partialorder %v265_v63, 1.0 }
  0xf3   :  { %505 = vmatmul.msk.f32.gmra.mxu3 %vm266_vm6, %v624_v46 }
 0x100   :  { %v319_v1 = vpop.f32.mrf.mxu0 }
 0x101   :  { %v320_v2 = vadd.f32 %v770_v0, %v319_v1 }
 0x103   :  { %v355_v3 = vmul.f32 0.5, %v320_v2 }
 0x105   :  { %vm357_vm7 = vcmp.ge.f32.partialorder %v355_v3, 1.0 }
 0x106   :  { %v482_v4 = vsel %vm357_vm7, 1.0, %v623_v44 }
 0x107   :  { %vm360_vm8 = vcmp.gt.f32.partialorder %v482_v4, 0.0 }
 0x108   :  { %v361_v6 = vsel %vm360_vm8, 0.0, %v355_v3 }
 0x10c   :  { %v322_v5 = vpop.f32.mrf.mxu0 }
 0x10d   :  { %v323_v49 = vadd.f32 %v770_v0, %v322_v5 }
 0x10f   :  { %v362_v7 = vsub.f32 %v323_v49, %v361_v6 }
 0x111   :  { %v363_v8 = vmul.f32 0.5, %v362_v7 }
 0x113   :  { %v364_v46 = vadd.f32 %v363_v8, %v361_v6 }
 0x115   :  { %vm365_vm9 = vcmp.ge.f32.partialorder %v364_v46, 1.0 }
 0x116   :  { %v325_v9 = vpop.f32.mrf.mxu0  ;;  %v483_v10 = vsel %vm365_vm9, 1.0, %v623_v44 }
 0x117   :  { %v326_v11 = vadd.f32 %v770_v0, %v325_v9  ;;  %vm368_vm10 = vcmp.gt.f32.partialorder %v483_v10, 0.0 }
 0x118   :  { %v369_v12 = vsel %vm368_vm10, 0.0, %v364_v46 }
 0x119   :  { %v370_v13 = vsub.f32 %v326_v11, %v369_v12 }
 0x11b   :  { %v371_v14 = vmul.f32 0.5, %v370_v13 }
 0x11d   :  { %v372_v15 = vadd.f32 %v371_v14, %v369_v12 }
 0x11f   :  { %vm373_vm11 = vcmp.ge.f32.partialorder %v372_v15, 1.0 }
 0x120   :  { %v328_v16 = vpop.f32.mrf.mxu1  ;;  %v484_v17 = vsel %vm373_vm11, 1.0, %v623_v44 }
 0x121   :  { %v329_v18 = vadd.f32 %v770_v0, %v328_v16  ;;  %vm376_vm12 = vcmp.gt.f32.partialorder %v484_v17, 0.0 }
 0x122   :  { %v377_v19 = vsel %vm376_vm12, 0.0, %v372_v15 }
 0x123   :  { %v378_v20 = vsub.f32 %v329_v18, %v377_v19 }
 0x125   :  { %v379_v21 = vmul.f32 0.5, %v378_v20 }
 0x127   :  { %v380_v22 = vadd.f32 %v379_v21, %v377_v19 }
 0x129   :  { %vm381_vm13 = vcmp.ge.f32.partialorder %v380_v22, 1.0 }
 0x12a   :  { %v331_v23 = vpop.f32.mrf.mxu1  ;;  %v485_v24 = vsel %vm381_vm13, 1.0, %v623_v44 }
 0x12b   :  { %v332_v25 = vadd.f32 %v770_v0, %v331_v23  ;;  %vm384_vm14 = vcmp.gt.f32.partialorder %v485_v24, 0.0 }
 0x12c   :  { %v385_v26 = vsel %vm384_vm14, 0.0, %v380_v22 }
 0x12d   :  { %v386_v27 = vsub.f32 %v332_v25, %v385_v26 }
 0x12f   :  { %v387_v28 = vmul.f32 0.5, %v386_v27 }
 0x131   :  { %v388_v29 = vadd.f32 %v387_v28, %v385_v26 }
 0x133   :  { %vm389_vm15 = vcmp.ge.f32.partialorder %v388_v29, 1.0 }
 0x134   :  { %v334_v32 = vpop.f32.mrf.mxu1  ;;  %v486_v30 = vsel %vm389_vm15, 1.0, %v623_v44 }
 0x135   :  { %v335_v34 = vadd.f32 %v770_v0, %v334_v32  ;;  %vm392_vm0 = vcmp.gt.f32.partialorder %v486_v30, 0.0 }
 0x136   :  { %v393_v35 = vsel %vm392_vm0, 0.0, %v388_v29 }
 0x137   :  { %v394_v36 = vsub.f32 %v335_v34, %v393_v35 }
 0x139   :  { %v395_v37 = vmul.f32 0.5, %v394_v36 }
 0x13b   :  { %v396_v39 = vadd.f32 %v395_v37, %v393_v35 }
 0x13d   :  { %vm397_vm1 = vcmp.ge.f32.partialorder %v396_v39, 1.0 }
 0x13e   :  { %v487_v31 = vsel %vm397_vm1, 1.0, %v623_v44 }
 0x13f   :  { %vm400_vm2 = vcmp.gt.f32.partialorder %v487_v31, 0.0 }
 0x140   :  { %v401_v42 = vsel %vm400_vm2, 0.0, %v396_v39 }
 0x144   :  { %v337_v40 = vpop.f32.mrf.mxu2 }
 0x145   :  { %v338_v41 = vadd.f32 %v770_v0, %v337_v40 }
 0x147   :  { %v402_v43 = vsub.f32 %v338_v41, %v401_v42 }
 0x149   :  { %v403_v33 = vmul.f32 0.5, %v402_v43 }
 0x14b   :  { %v404_v45 = vadd.f32 %v403_v33, %v401_v42 }
 0x14d   :  { %vm405_vm3 = vcmp.ge.f32.partialorder %v404_v45, 1.0 }
 0x14e   :  { %v340_v47 = vpop.f32.mrf.mxu2  ;;  %v488_v48 = vsel %vm405_vm3, 1.0, %v623_v44 }
 0x14f   :  { %v341_v50 = vadd.f32 %v770_v0, %v340_v47  ;;  %vm408_vm4 = vcmp.gt.f32.partialorder %v488_v48, 0.0 }
 0x150   :  { %v409_v51 = vsel %vm408_vm4, 0.0, %v404_v45 }
 0x151   :  { %v410_v52 = vsub.f32 %v341_v50, %v409_v51 }
 0x153   :  { %v411_v53 = vmul.f32 0.5, %v410_v52 }
 0x155   :  { %v412_v54 = vadd.f32 %v411_v53, %v409_v51 }
 0x157   :  { %vm413_vm5 = vcmp.ge.f32.partialorder %v412_v54, 1.0 }
 0x158   :  { %v343_v55 = vpop.f32.mrf.mxu2  ;;  %v489_v38 = vsel %vm413_vm5, 1.0, %v623_v44 }
 0x159   :  { %v344_v56 = vadd.f32 %v770_v0, %v343_v55  ;;  %vm416_vm6 = vcmp.gt.f32.partialorder %v489_v38, 0.0 }
 0x15a   :  { %v417_v57 = vsel %vm416_vm6, 0.0, %v412_v54 }
 0x15b   :  { %v418_v58 = vsub.f32 %v344_v56, %v417_v57 }
 0x15d   :  { %v419_v59 = vmul.f32 0.5, %v418_v58 }
 0x15f   :  { %v420_v60 = vadd.f32 %v419_v59, %v417_v57 }
 0x161   :  { %vm421_vm7 = vcmp.ge.f32.partialorder %v420_v60, 1.0 }
 0x162   :  { %v346_v61 = vpop.f32.mrf.mxu3  ;;  %v490_v62 = vsel %vm421_vm7, 1.0, %v623_v44 }
 0x163   :  { %v347_v63 = vadd.f32 %v770_v0, %v346_v61  ;;  %vm424_vm8 = vcmp.gt.f32.partialorder %v490_v62, 0.0 }
 0x164   :  { %v425_v1 = vsel %vm424_vm8, 0.0, %v420_v60 }
 0x165   :  { %v427_v2 = vsub.f32 %v347_v63, %v425_v1 }
 0x167   :  { %v428_v3 = vmul.f32 0.5, %v427_v2 }
 0x169   :  { %v429_v4 = vadd.f32 %v428_v3, %v425_v1 }
 0x16b   :  { %vm430_vm9 = vcmp.ge.f32.partialorder %v429_v4, 1.0 }
 0x16c   :  { %v349_v5 = vpop.f32.mrf.mxu3  ;;  %v491_v49 = vsel %vm430_vm9, 1.0, %v623_v44 }
 0x16d   :  { %v350_v6 = vadd.f32 %v770_v0, %v349_v5  ;;  %vm433_vm10 = vcmp.gt.f32.partialorder %v491_v49, 0.0  ;;  %v435_v16 = vadd.f32 %v491_v49, %v490_v62 }
 0x16e   :  { %v434_v7 = vsel %vm433_vm10, 0.0, %v429_v4 }
 0x16f   :  { %v436_v8 = vsub.f32 %v350_v6, %v434_v7 }
 0x171   :  { %v437_v46 = vmul.f32 0.5, %v436_v8 }
 0x173   :  { %v438_v9 = vadd.f32 %v437_v46, %v434_v7 }
 0x175   :  { %vm439_vm11 = vcmp.ge.f32.partialorder %v438_v9, 1.0 }
 0x176   :  { %v352_v10 = vpop.f32.mrf.mxu3  ;;  %v492_v11 = vsel %vm439_vm11, 1.0, %v623_v44 }
 0x177   :  { %v353_v12 = vadd.f32 %v770_v0, %v352_v10  ;;  %vm442_vm12 = vcmp.gt.f32.partialorder %v492_v11, 0.0  ;;  %v444_v18 = vadd.f32 %v492_v11, %v435_v16 }
 0x178   :  { %v443_v13 = vsel %vm442_vm12, 0.0, %v438_v9 }
 0x179   :  { %v445_v14 = vsub.f32 %v353_v12, %v443_v13 }
 0x17b   :  { %v446_v15 = vmul.f32 0.5, %v445_v14 }
 0x17d   :  { %v447_v17 = vadd.f32 %v446_v15, %v443_v13 }
 0x17f   :  { %vm448_vm13 = vcmp.ge.f32.partialorder %v447_v17, 1.0 }
 0x180   :  { %v493_v19 = vsel %vm448_vm13, 1.0, %v623_v44 }
 0x181   :  { %v451_v20 = vadd.f32 %v493_v19, %v444_v18 }
 0x183   :  { %452 = vst [vmem:[#allocation6] sm:$0xff] %v451_v20 }
 0x184   :  { %463 = dma.vmem_to_hbm [thread:$0]  %s459_s26, 128, %s461_s3, [#allocation5]  }
 0x185   :  { %617 = dma.done.wait [#allocation5], 128  }
 0x186   :  { %618 = vsyncadd [#allocation5], 4294967168 }
 0x187   :  { %468 = vsyncpa [#allocation4], 1 }
 0x188   :  { %469 = vsyncpa [#allocation5], 1 }

</bundles_post_ra>
